<compile_context>
chip_gen: v7x
topology: tpu7x:2x2x1
jax: 0.10.0
libtpu: 0.0.40
codegen_flags: <defaults>
</compile_context>

<pallas_src>
import functools

import jax
import jax.numpy as jnp
from jax.experimental import pallas as pl
from jax.experimental.pallas import tpu as pltpu


# ---------------------------------------------------------------------------
# Activations / gating functions supported by the PyTorch _SE module.
# ---------------------------------------------------------------------------
def _apply_named_fn(x, name):
    if name == "relu":
        return jnp.maximum(x, 0.0)
    if name == "relu6":
        return jnp.clip(x, 0.0, 6.0)
    if name == "swish":
        return x * jax.nn.sigmoid(x)
    if name == "hard_swish":
        return jnp.clip(x + 3.0, 0.0, 6.0) / 6.0 * x
    if name == "sigmoid":
        return jax.nn.sigmoid(x)
    if name == "hard_sigmoid":
        return jnp.clip(x + 3.0, 0.0, 6.0) / 6.0
    raise ValueError(f"unknown activation/gating fn: {name}")


# ---------------------------------------------------------------------------
# Generation-aware VMEM budgeting.
# ---------------------------------------------------------------------------
def _vmem_capacity_bytes() -> int:
    try:
        cap = int(getattr(pltpu.get_tpu_info(), "vmem_capacity_bytes"))
        if cap > 0:
            return cap
    except Exception:
        pass
    return 64 << 20  # conservative fallback = v7x per-TC VMEM


def _vmem_limit_bytes(need: int, cap: int) -> int:
    # Never request more than physical VMEM minus headroom (v7x has only 64 MiB).
    ceiling = max(cap - (4 << 20), 16 << 20)
    return int(min(max(need, 32 << 20), ceiling))


# ---------------------------------------------------------------------------
# Single-pass kernel: whole-image (B, C, HW) blocks.
# ---------------------------------------------------------------------------
def _se_single_pass_kernel(x_ref, w1_ref, b1_ref, w2_ref, b2_ref, o_ref, *,
                           activation_fn, gating_fn):
    x = x_ref[...]                                         # (B, C, HW), input dtype
    hw = x.shape[-1]
    # Global average pool over spatial (lanes); f32 accumulation fused into the
    # reduce — no materialized f32 copy of the tile.
    y = jnp.sum(x, axis=-1, dtype=jnp.float32) * (1.0 / float(hw))      # (B, C)
    # 1x1 "reduce" conv == (B, C) @ (C, Cr), then activation (f32).
    h = jnp.dot(y.astype(w1_ref.dtype), w1_ref[...],
                preferred_element_type=jnp.float32) + b1_ref[...]       # (B, Cr)
    h = _apply_named_fn(h, activation_fn)
    # 1x1 "expand" conv == (B, Cr) @ (Cr, C), then gating fn (f32).
    g = jnp.dot(h.astype(w2_ref.dtype), w2_ref[...],
                preferred_element_type=jnp.float32) + b2_ref[...]       # (B, C)
    g = _apply_named_fn(g, gating_fn)
    # Gate multiply in the input dtype; per-channel scalar broadcast over lanes.
    o_ref[...] = x * g.astype(x.dtype)[:, :, None]


def _se_single_pass(x3, w1t, b1, w2t, b2, batch_block, activation_fn, gating_fn,
                    vmem_cap, itemsize, weight_bytes):
    N, C, HW = x3.shape
    Cr = w1t.shape[1]
    B = batch_block
    blk_bytes = B * C * HW * itemsize
    vmem_need = 4 * blk_bytes + 2 * weight_bytes + (2 << 20)
    vmem_limit = _vmem_limit_bytes(vmem_need, vmem_cap)

    cost = pl.CostEstimate(
        flops=int(2 * N * HW * C + 4 * N * C * Cr),
        transcendentals=int(N * (C + Cr)),
        bytes_accessed=int(2 * N * HW * C * itemsize + weight_bytes),
    )
    kernel = functools.partial(_se_single_pass_kernel,
                               activation_fn=activation_fn, gating_fn=gating_fn)

    # TODO(synk): on v7x with tiny inference batches (grid size 1-2), shard the
    # batch axis across the two TensorCores (pltpu.CORE_PARALLEL / pl.core_map)
    # so both HBM paths are used.
    return pl.pallas_call(
        kernel,
        out_shape=jax.ShapeDtypeStruct((N, C, HW), x3.dtype),
        grid_spec=pltpu.PrefetchScalarGridSpec(
            num_scalar_prefetch=0,
            grid=(pl.cdiv(N, B),),
            in_specs=[
                pl.BlockSpec((B, C, HW), lambda n: (n, 0, 0)),   # x (NCHW, spatial flat)
                pl.BlockSpec((C, Cr), lambda n: (0, 0)),         # w_reduce^T (input dtype)
                pl.BlockSpec((1, Cr), lambda n: (0, 0)),         # b_reduce (f32)
                pl.BlockSpec((Cr, C), lambda n: (0, 0)),         # w_expand^T (input dtype)
                pl.BlockSpec((1, C), lambda n: (0, 0)),          # b_expand (f32)
            ],
            out_specs=pl.BlockSpec((B, C, HW), lambda n: (n, 0, 0)),
        ),
        compiler_params=pltpu.CompilerParams(
            dimension_semantics=("parallel",),
            vmem_limit_bytes=vmem_limit,
        ),
        cost_estimate=cost,
    )(x3, w1t, b1, w2t, b2)


# ---------------------------------------------------------------------------
# Two-pass fallback for whole images that do not fit VMEM (v7x / large HW).
# Pass 1: HW-tiled pool + squeeze -> per-image gate (N, C, 1) in f32.
# Pass 2: HW-tiled gate-apply (x * g).
# ---------------------------------------------------------------------------
def _se_pool_squeeze_kernel(x_ref, w1_ref, b1_ref, w2_ref, b2_ref, g_ref, acc_ref, *,
                            hw_total, activation_fn, gating_fn):
    t = pl.program_id(1)

    @pl.when(t == 0)
    def _():
        acc_ref[...] = jnp.zeros_like(acc_ref)

    x = x_ref[...]                                         # (1, C, T), input dtype
    T = x.shape[-1]
    # Mask lanes past the end of the image (last HW tile may be padded).
    lane = jax.lax.broadcasted_iota(jnp.int32, (1, 1, T), 2)
    valid = hw_total - t * T
    xm = jnp.where(lane < valid, x, jnp.zeros_like(x))
    acc_ref[...] += jnp.sum(xm, axis=-1, dtype=jnp.float32)             # (1, C) f32

    @pl.when(t == pl.num_programs(1) - 1)
    def _():
        y = acc_ref[...] * (1.0 / float(hw_total))                       # (1, C) f32
        h = jnp.dot(y.astype(w1_ref.dtype), w1_ref[...],
                    preferred_element_type=jnp.float32) + b1_ref[...]    # (1, Cr)
        h = _apply_named_fn(h, activation_fn)
        g = jnp.dot(h.astype(w2_ref.dtype), w2_ref[...],
                    preferred_element_type=jnp.float32) + b2_ref[...]    # (1, C)
        g = _apply_named_fn(g, gating_fn)
        g_ref[...] = g[:, :, None]                                       # (1, C, 1)


def _se_gate_kernel(x_ref, g_ref, o_ref):
    x = x_ref[...]                                         # (1, C, T)
    o_ref[...] = x * g_ref[...].astype(x.dtype)            # gate broadcast over lanes


def _se_two_pass(x3, w1t, b1, w2t, b2, activation_fn, gating_fn,
                 vmem_cap, itemsize, weight_bytes, budget, hw_tile=None):
    N, C, HW = x3.shape
    Cr = w1t.shape[1]
    dtype = x3.dtype

    if hw_tile is None:
        # ~2 MB x-blocks, lane-dense (multiple of 128) HW tiles.
        T = (2 << 20) // max(C * itemsize, 1)
        T = max(128, (T // 128) * 128)
        while T > 128 and 4 * C * T * itemsize + weight_bytes + (2 << 20) > budget:
            T = max(128, ((T // 2) // 128) * 128)
    else:
        T = hw_tile
    if T >= HW:
        T = HW                       # full-extent block (no (8,128) constraint)
    nt = pl.cdiv(HW, T)

    blk_bytes = C * T * itemsize
    vmem_need = 4 * blk_bytes + 2 * weight_bytes + (2 << 20)
    vmem_limit = _vmem_limit_bytes(vmem_need, vmem_cap)

    # ---- Pass 1: pool + squeeze -> gate (N, C, 1) ----
    pool_cost = pl.CostEstimate(
        flops=int(N * HW * C + 4 * N * C * Cr),
        transcendentals=int(N * (C + Cr)),
        bytes_accessed=int(N * HW * C * itemsize + weight_bytes + N * C * 4),
    )
    pool_kernel = functools.partial(_se_pool_squeeze_kernel, hw_total=HW,
                                    activation_fn=activation_fn, gating_fn=gating_fn)
    g = pl.pallas_call(
        pool_kernel,
        out_shape=jax.ShapeDtypeStruct((N, C, 1), jnp.float32),
        grid_spec=pltpu.PrefetchScalarGridSpec(
            num_scalar_prefetch=0,
            grid=(N, nt),
            in_specs=[
                pl.BlockSpec((1, C, T), lambda n, t: (n, 0, t)),
                pl.BlockSpec((C, Cr), lambda n, t: (0, 0)),
                pl.BlockSpec((1, Cr), lambda n, t: (0, 0)),
                pl.BlockSpec((Cr, C), lambda n, t: (0, 0)),
                pl.BlockSpec((1, C), lambda n, t: (0, 0)),
            ],
            out_specs=pl.BlockSpec((1, C, 1), lambda n, t: (n, 0, 0)),
            scratch_shapes=[pltpu.VMEM((1, C), jnp.float32)],
        ),
        compiler_params=pltpu.CompilerParams(
            dimension_semantics=("parallel", "arbitrary"),
            vmem_limit_bytes=vmem_limit,
        ),
        cost_estimate=pool_cost,
    )(x3, w1t, b1, w2t, b2)

    # ---- Pass 2: out = g * x ----
    gate_cost = pl.CostEstimate(
        flops=int(N * HW * C),
        transcendentals=0,
        bytes_accessed=int(2 * N * HW * C * itemsize + N * C * 4),
    )
    out = pl.pallas_call(
        _se_gate_kernel,
        out_shape=jax.ShapeDtypeStruct((N, C, HW), dtype),
        grid_spec=pltpu.PrefetchScalarGridSpec(
            num_scalar_prefetch=0,
            grid=(N, nt),
            in_specs=[
                pl.BlockSpec((1, C, T), lambda n, t: (n, 0, t)),
                pl.BlockSpec((1, C, 1), lambda n, t: (n, 0, 0)),
            ],
            out_specs=pl.BlockSpec((1, C, T), lambda n, t: (n, 0, t)),
        ),
        compiler_params=pltpu.CompilerParams(
            dimension_semantics=("parallel", "parallel"),
            vmem_limit_bytes=vmem_limit,
        ),
        cost_estimate=gate_cost,
    )(x3, g)
    return out


# ---------------------------------------------------------------------------
# Public wrapper.
# ---------------------------------------------------------------------------
def se_forward(x, w_reduce, b_reduce, w_expand, b_expand,
               activation_fn="swish", gating_fn="sigmoid",
               force_two_pass=False, hw_tile=None):
    """x: (N, C, H, W); w_reduce: (Cr, C); b_reduce: (Cr,);
       w_expand: (C, Cr); b_expand: (C,).  Returns (N, C, H, W)."""
    N, C, H, W = x.shape
    Cr = w_reduce.shape[0]
    HW = H * W
    dtype = x.dtype
    itemsize = jnp.dtype(dtype).itemsize

    # NCHW consumed directly: only a free reshape (no HBM transpose round trip).
    x3 = x.reshape(N, C, HW)
    # Pre-transpose the tiny 1x1-conv weights so the squeeze path is row @ matrix;
    # cast weights to the input dtype (MXU-native bf16 where applicable), keep
    # biases f32 (negligible size, added to f32 accumulators).
    w1t = jnp.transpose(w_reduce).astype(dtype)           # (C, Cr)
    w2t = jnp.transpose(w_expand).astype(dtype)           # (Cr, C)
    b1 = b_reduce.reshape(1, Cr).astype(jnp.float32)
    b2 = b_expand.reshape(1, C).astype(jnp.float32)

    vmem_cap = _vmem_capacity_bytes()
    budget = vmem_cap // 2                                 # path-selection budget
    weight_bytes = 2 * C * Cr * itemsize + (C + Cr) * 4
    per_img_bytes = C * HW * itemsize

    # Batch several images per grid step targeting ~2 MB blocks (keeps HBM near
    # roofline for late stages where a single image is only ~100 KB).
    target_blk = 2 << 20
    B = int(max(1, min(N, target_blk // max(per_img_bytes, 1))))
    while B > 1 and 4 * B * per_img_bytes + weight_bytes + (2 << 20) > budget:
        B = max(1, B // 2)
    single_pass_fits = 4 * B * per_img_bytes + weight_bytes + (2 << 20) <= budget

    if single_pass_fits and not force_two_pass:
        out3 = _se_single_pass(x3, w1t, b1, w2t, b2, B, activation_fn, gating_fn,
                               vmem_cap, itemsize, weight_bytes)
    else:
        out3 = _se_two_pass(x3, w1t, b1, w2t, b2, activation_fn, gating_fn,
                            vmem_cap, itemsize, weight_bytes, budget, hw_tile)

    # TODO(synk): the biggest remaining win is fusing the g*x gate (and pool)
    # into the adjacent MBConv kernel to remove this op's HBM round trip, and
    # padding odd channel counts (144/240/672/...) to multiples of 128 at the
    # call site for lane-dense stores.
    return out3.reshape(N, C, H, W)


# ---------------------------------------------------------------------------
# Plain-JAX reference mirroring the PyTorch _SE module.
# ---------------------------------------------------------------------------
def se_reference(x, w_reduce, b_reduce, w_expand, b_expand,
                 activation_fn="swish", gating_fn="sigmoid"):
    y = jnp.mean(x, axis=(2, 3), keepdims=True)                      # (N, C, 1, 1)
    y = jnp.einsum("rc,nchw->nrhw", w_reduce, y) + b_reduce[None, :, None, None]
    y = _apply_named_fn(y, activation_fn)
    g = jnp.einsum("cr,nrhw->nchw", w_expand, y) + b_expand[None, :, None, None]
    g = _apply_named_fn(g, gating_fn)
    return g * x


if __name__ == "__main__":
    # Deterministic parameters / inputs (synthetic, no checkpoint).
    N, C, Cr = 2, 8, 2
    key = jax.random.PRNGKey(0)
    kx, k1, kb1, k2, kb2, kx2 = jax.random.split(key, 6)

    # nn.Conv2d(C, Cr, 1, bias=True) weight is (Cr, C, 1, 1) -> stored as (Cr, C)
    w_reduce = jax.random.normal(k1, (Cr, C), dtype=jnp.float32) * (1.0 / jnp.sqrt(C))
    b_reduce = jax.random.normal(kb1, (Cr,), dtype=jnp.float32) * 0.1
    # nn.Conv2d(Cr, C, 1, bias=True) weight is (C, Cr, 1, 1) -> stored as (C, Cr)
    w_expand = jax.random.normal(k2, (C, Cr), dtype=jnp.float32) * (1.0 / jnp.sqrt(Cr))
    b_expand = jax.random.normal(kb2, (C,), dtype=jnp.float32) * 0.1

    # 1) Default path (single-pass, whole-image blocks, batched per grid step).
    H = W = 16
    x = jax.random.normal(kx, (N, C, H, W), dtype=jnp.float32)
    out = jax.block_until_ready(se_forward(x, w_reduce, b_reduce, w_expand, b_expand))
    ref = se_reference(x, w_reduce, b_reduce, w_expand, b_expand)
    assert out.shape == (N, C, H, W)
    assert jnp.allclose(out, ref, atol=1e-5, rtol=1e-5), "single-pass mismatch vs reference"

    # 2) Two-pass HW-tiled fallback (as used on v7x for large-resolution stages),
    #    forced at a small shape with a partial last HW tile to exercise masking.
    H2 = W2 = 15
    x2 = jax.random.normal(kx2, (N, C, H2, W2), dtype=jnp.float32)
    out2 = jax.block_until_ready(
        se_forward(x2, w_reduce, b_reduce, w_expand, b_expand,
                   force_two_pass=True, hw_tile=128))
    ref2 = se_reference(x2, w_reduce, b_reduce, w_expand, b_expand)
    assert out2.shape == (N, C, H2, W2)
    assert jnp.allclose(out2, ref2, atol=1e-5, rtol=1e-5), "two-pass mismatch vs reference"

    print("KERNEL_OK")
</pallas_src>

<mosaic_0001>
module attributes {stable_mosaic.version = 11 : i64} {
  func.func @_se_single_pass_kernel(%arg0: i32, %arg1: memref<2x8x256xf32, #tpu.memory_space<vmem>>, %arg2: memref<8x2xf32, #tpu.memory_space<vmem>>, %arg3: memref<1x2xf32, #tpu.memory_space<vmem>>, %arg4: memref<2x8xf32, #tpu.memory_space<vmem>>, %arg5: memref<1x8xf32, #tpu.memory_space<vmem>>, %arg6: memref<2x8x256xf32, #tpu.memory_space<vmem>>) attributes {dimension_semantics = [#tpu.dimension_semantics<parallel>], iteration_bounds = array<i64: 1>, scalar_prefetch = 0 : i64, scratch_operands = 0 : i64, tpu.core_type = #tpu.core_type<tc>, window_params = [{transform_indices = @transform_0, window_bounds = array<i64: 2, 8, 256>}, {pipeline_mode = #tpu.pipeline_mode<synchronous>, transform_indices = @transform_1, window_bounds = array<i64: 8, 2>}, {pipeline_mode = #tpu.pipeline_mode<synchronous>, transform_indices = @transform_2, window_bounds = array<i64: 1, 2>}, {pipeline_mode = #tpu.pipeline_mode<synchronous>, transform_indices = @transform_3, window_bounds = array<i64: 2, 8>}, {pipeline_mode = #tpu.pipeline_mode<synchronous>, transform_indices = @transform_4, window_bounds = array<i64: 1, 8>}, {transform_indices = @transform_5, window_bounds = array<i64: 2, 8, 256>}]} {
    %c0 = arith.constant 0 : index
    %c0_0 = arith.constant 0 : index
    %c0_1 = arith.constant 0 : index
    %0 = vector.load %arg1[%c0, %c0_0, %c0_1] : memref<2x8x256xf32, #tpu.memory_space<vmem>>, vector<2x8x256xf32>
    %cst = arith.constant dense<0.000000e+00> : vector<2x8xf32>
    %1 = vector.multi_reduction <add>, %0, %cst [2] : vector<2x8x256xf32> to vector<2x8xf32>
    %cst_2 = arith.constant 3.906250e-03 : f32
    %2 = vector.broadcast %cst_2 : f32 to vector<2x8xf32>
    %3 = arith.mulf %1, %2 : vector<2x8xf32>
    %c0_3 = arith.constant 0 : index
    %c0_4 = arith.constant 0 : index
    %4 = vector.load %arg2[%c0_3, %c0_4] : memref<8x2xf32, #tpu.memory_space<vmem>>, vector<8x2xf32>
    %cst_5 = arith.constant dense<0.000000e+00> : vector<2x2xf32>
    %5 = tpu.matmul %3, %4, %cst_5 {dimension_numbers = #tpu.dot_dimension_numbers<[1], [0], [0], [1], [0, 0, 1, 1], [], []>} : vector<2x8xf32>, vector<8x2xf32>, vector<2x2xf32> -> vector<2x2xf32>
    %c0_6 = arith.constant 0 : index
    %c0_7 = arith.constant 0 : index
    %6 = vector.load %arg3[%c0_6, %c0_7] : memref<1x2xf32, #tpu.memory_space<vmem>>, vector<1x2xf32>
    %7 = vector.broadcast %6 : vector<1x2xf32> to vector<2x2xf32>
    %8 = arith.addf %5, %7 : vector<2x2xf32>
    %9 = arith.negf %8 : vector<2x2xf32>
    %10 = math.exp %9 : vector<2x2xf32>
    %cst_8 = arith.constant 1.000000e+00 : f32
    %11 = vector.broadcast %cst_8 : f32 to vector<2x2xf32>
    %12 = arith.addf %11, %10 : vector<2x2xf32>
    %13 = arith.divf %11, %12 : vector<2x2xf32>
    %14 = arith.mulf %8, %13 : vector<2x2xf32>
    %c0_9 = arith.constant 0 : index
    %c0_10 = arith.constant 0 : index
    %15 = vector.load %arg4[%c0_9, %c0_10] : memref<2x8xf32, #tpu.memory_space<vmem>>, vector<2x8xf32>
    %cst_11 = arith.constant dense<0.000000e+00> : vector<2x8xf32>
    %16 = tpu.matmul %14, %15, %cst_11 {dimension_numbers = #tpu.dot_dimension_numbers<[1], [0], [0], [1], [0, 0, 1, 1], [], []>} : vector<2x2xf32>, vector<2x8xf32>, vector<2x8xf32> -> vector<2x8xf32>
    %c0_12 = arith.constant 0 : index
    %c0_13 = arith.constant 0 : index
    %17 = vector.load %arg5[%c0_12, %c0_13] : memref<1x8xf32, #tpu.memory_space<vmem>>, vector<1x8xf32>
    %18 = vector.broadcast %17 : vector<1x8xf32> to vector<2x8xf32>
    %19 = arith.addf %16, %18 : vector<2x8xf32>
    %20 = arith.negf %19 : vector<2x8xf32>
    %21 = math.exp %20 : vector<2x8xf32>
    %cst_14 = arith.constant 1.000000e+00 : f32
    %22 = vector.broadcast %cst_14 : f32 to vector<2x8xf32>
    %23 = arith.addf %22, %21 : vector<2x8xf32>
    %24 = arith.divf %22, %23 : vector<2x8xf32>
    %25 = vector.shape_cast %24 : vector<2x8xf32> to vector<2x8x1xf32>
    %26 = vector.broadcast %25 : vector<2x8x1xf32> to vector<2x8x256xf32>
    %27 = arith.mulf %0, %26 : vector<2x8x256xf32>
    %c0_15 = arith.constant 0 : index
    %c0_16 = arith.constant 0 : index
    %c0_17 = arith.constant 0 : index
    %28 = vector.load %arg6[%c0_15, %c0_16, %c0_17] : memref<2x8x256xf32, #tpu.memory_space<vmem>>, vector<2x8x256xf32>
    tpu.vector_store %arg6[%c0_15, %c0_16, %c0_17], %27 {strides = array<i32>} : memref<2x8x256xf32, #tpu.memory_space<vmem>>, vector<2x8x256xf32>,
    return
  }
  func.func @transform_0(%arg0: i32) -> (i32, i32, i32) {
    %c0_i32 = arith.constant 0 : i32
    %c0_i32_0 = arith.constant 0 : i32
    %c0_i32_1 = arith.constant 0 : i32
    return %arg0, %c0_i32, %c0_i32_0 : i32, i32, i32
  }
  func.func @transform_1(%arg0: i32) -> (i32, i32) {
    %c0_i32 = arith.constant 0 : i32
    %c0_i32_0 = arith.constant 0 : i32
    %c0_i32_1 = arith.constant 0 : i32
    return %c0_i32, %c0_i32_0 : i32, i32
  }
  func.func @transform_2(%arg0: i32) -> (i32, i32) {
    %c0_i32 = arith.constant 0 : i32
    %c0_i32_0 = arith.constant 0 : i32
    %c0_i32_1 = arith.constant 0 : i32
    return %c0_i32, %c0_i32_0 : i32, i32
  }
  func.func @transform_3(%arg0: i32) -> (i32, i32) {
    %c0_i32 = arith.constant 0 : i32
    %c0_i32_0 = arith.constant 0 : i32
    %c0_i32_1 = arith.constant 0 : i32
    return %c0_i32, %c0_i32_0 : i32, i32
  }
  func.func @transform_4(%arg0: i32) -> (i32, i32) {
    %c0_i32 = arith.constant 0 : i32
    %c0_i32_0 = arith.constant 0 : i32
    %c0_i32_1 = arith.constant 0 : i32
    return %c0_i32, %c0_i32_0 : i32, i32
  }
  func.func @transform_5(%arg0: i32) -> (i32, i32, i32) {
    %c0_i32 = arith.constant 0 : i32
    %c0_i32_0 = arith.constant 0 : i32
    %c0_i32_1 = arith.constant 0 : i32
    return %arg0, %c0_i32, %c0_i32_0 : i32, i32, i32
  }
}

</mosaic_0001>

<bundles_post_ra>
// kernel: tpu_custom_call.1
= control target key start
LH: loop header
LB: loop body
LE: loop exit
PB: predicated region body
PF: predicated region fallthrough
CT: control target
= control target key end

     0   :  { %10 = vsyncpa [#allocation3], 0  ;;  %s457_s0 = inlined_call_operand.hbm [shape: f32[2,8,256], index: 0, kind: input, shape index: {}]   ;;  %s458_s1 = inlined_call_operand.vmem [shape: f32[8,2], index: 1, kind: input, shape index: {}]   ;;  %s459_s2 = inlined_call_operand.vmem [shape: f32[1,2], index: 2, kind: input, shape index: {}]   ;;  %s460_s3 = inlined_call_operand.vmem [shape: f32[2,8], index: 3, kind: input, shape index: {}]   ;;  %s461_s4 = inlined_call_operand.vmem [shape: f32[1,8], index: 4, kind: input, shape index: {}]   ;;  %s462_s5 = inlined_call_operand.hbm [shape: f32[2,8,256], index: 5, kind: output, shape index: {}]  }
   0x1   :  { %11 = vsyncpa [#allocation4], 0  ;;  %s363_s18 = smov [#allocation2]   ;;  %s315_s22 = scalar_lea.hbm %s457_s0, 512 }
   0x2   :  { %s17_s19 = sshll.u32 %s363_s18, 4  ;;  %p316_p0 = scmp.ne.s32.totalorder %s457_s0, %s315_s22  ;;  %s18_s19 = int_to_ptr.vmem [resolvable:$true] %s17_s19 }
   0x3   :  { %p319_p1 = scmp.lt.u32.totalorder %s315_s22, %s457_s0 }
   0x5   :  { %p321_p2 = pnand %p319_p1, %p316_p0 }
   0x7   :  { %324 = shalt.err (!%p321_p2)
}
   0x8   :  { %s325_s27 = scalar_lea.vmem %s18_s19, 512  ;;  %p330_p4 = scmp.lt.s32.totalorder %s18_s19, %s18_s19 }
   0x9   :  { %p326_p3 = scmp.ne.s32.totalorder %s18_s19, %s325_s27  ;;  %p331_p5 = scmp.lt.s32.totalorder %s325_s27, %s325_s27 }
   0xb   :  { %p332_p6 = por %p331_p5, %p330_p4 }
   0xd   :  { %p333_p7 = pnand %p332_p6, %p326_p3 }
   0xf   :  { %336 = shalt.err (!%p333_p7)
}
  0x10   :  { %s364_s28 = smov 256   ;;  %s365_s29 = smov 16  }
  0x11   :  { %23 = dma.hbm_to_vmem [thread:$0]  %s457_s0, 512, %s18_s19, [#allocation3], %s364_s28, %s364_s28, %s365_s29  }
  0x12   :  { %359 = dma.done.wait [#allocation3], 512  }
  0x13   :  { %360 = vsyncadd [#allocation3], 4294966784  ;;  %v414_v0 = vld [vmem:[#allocation2] sm:$0xff]  ;;  %v416_v1 = vld [vmem:[#allocation2 + $0x8] sm:$0xff]  ;;  %v366_v7 = vmov 0.0   ;;  %vm367_vm0 = vmmov 0   ;;  %v57_v8 = vlaneseq }
  0x14   :  { %v418_v2 = vld [vmem:[#allocation2 + $0x10] sm:$0xff]  ;;  %v39_v3 = vadd.f32 %v416_v1, %v414_v0  ;;  %v422_v4 = vld [vmem:[#allocation2 + $0x18] sm:$0xff]  ;;  %v47_v6 = vld [vmem:[%s458_s1] sm:$0xff]  ;;  %291 = vmatprep.subr.mxu0 %v366_v7  ;;  %293 = vmatprep.mubr.msk.f32.mxu0 %vm367_vm0, %v366_v7  ;;  %vm67_vm1 = vcmask 1041409   ;;  %vm69_vm2 = vcmask 64512   ;;  %vm161_vm3 = vcmask 1041408  }
  0x15   :  { %v42_v5 = vadd.f32 %v422_v4, %v418_v2  ;;  %292 = vmatpush3.msra.mxu0 %v47_v6  ;;  %296 = vmatprep.subr.mxu1 %v366_v7  ;;  %v58_v9 = vand.u32 127, %v57_v8  ;;  %v60_v10 = vshrl.u32 %v57_v8, 7  ;;  %v149_v19 = vld [vmem:[%s460_s3] sm:$0x3]  ;;  %vm157_vm4 = vcmask 15360  }
  0x16   :  { %40 = vadd.xlane.f32.xlu0 %v39_v3  ;;  %298 = vmatprep.mubr.msk.f32.mxu1 %vm367_vm0, %v366_v7  ;;  %v280_v20 = vld [vmem:[%s459_s2] ss:$0 sm:$0xff]  ;;  %s368_s2 = smov [#allocation5]  }
  0x17   :  { %v61_v12 = vsub.s32 %v58_v9, %v60_v10  ;;  %297 = vmatpush3.msk.msra.mxu1 %vm161_vm3, %v149_v19  ;;  %v283_v29 = vld [vmem:[%s461_s4] ss:$0 sm:$0xff]  ;;  %v243_v36 = vsub.s32 0, %v60_v10  ;;  %v250_v39 = vsub.s32 1, %v60_v10  ;;  %s268_s4 = sshll.u32 %s368_s2, 4  ;;  %s269_s4 = int_to_ptr.vmem [resolvable:$true] %s268_s4 }
  0x18   :  { %s337_s12 = scalar_lea.vmem %s269_s4, 512  ;;  %p342_p9 = scmp.lt.s32.totalorder %s269_s4, %s269_s4 }
  0x19   :  { %p338_p8 = scmp.ne.s32.totalorder %s269_s4, %s337_s12  ;;  %p343_p10 = scmp.lt.s32.totalorder %s337_s12, %s337_s12 }
  0x1a   :  { %43 = vadd.xlane.f32.xlu0 %v42_v5 }
  0x1b   :  { %p344_p11 = por %p343_p10, %p342_p9 }
  0x1d   :  { %p345_p12 = pnand %p344_p11, %p338_p8 }
  0xa3   :  { %v41_v11 = vpop.xlane.xlu0 %40 }
  0xa4   :  { %v45_v13 = vmul.f32 0.00390625, %v41_v11 }
  0xa6   :  { %v62_v16 = vrot.slane %v45_v13, %v61_v12 }
  0xa7   :  { %v44_v14 = vpop.xlane.xlu0 %43 }
  0xa8   :  { %v46_v15 = vmul.f32 0.00390625, %v44_v14 }
  0xaa   :  { %v66_v17 = vrot.slane %v46_v15, %v61_v12 }
  0xac   :  { %v68_v18 = vsel %vm67_vm1, %v66_v17, %v62_v16 }
  0xad   :  { %294 = vmatmul.mubr.msk.f32.vlgmr.msra.gmra.mrb[0].mxu0 %vm69_vm2, %v68_v18 }
 0x180   :  { %v138_v21 = vpop.f32.mrb[0].mxu0 }
 0x181   :  { %v139_v22 = vadd.f32 %v280_v20, %v138_v21  ;;  %v295_v23 = vpop.f32.mrb[1].mxu0 }
 0x183   :  { %v282_v24 = vmul.f32 -1.442695, %v139_v22 }
 0x185   :  { %307 = vpow2.f32 %v282_v24 }
 0x18f   :  { %v308_v25 = vpop.eup %307 }
 0x190   :  { %v145_v26 = vadd.f32 1.0, %v308_v25 }
 0x192   :  { %309 = vrcp.f32 %v145_v26 }
 0x19c   :  { %v310_v27 = vpop.eup %309 }
 0x19d   :  { %v148_v28 = vmul.f32 %v310_v27, %v139_v22 }
 0x19f   :  { %299 = vmatmul.mubr.msk.f32.vlgmr.msra.gmra.mrb[0].mxu1 %vm157_vm4, %v148_v28 }
 0x272   :  { %v231_v30 = vpop.f32.mrb[0].mxu1 }
 0x273   :  { %v232_v31 = vadd.f32 %v283_v29, %v231_v30  ;;  %v300_v32 = vpop.f32.mrb[1].mxu1 }
 0x275   :  { %v286_v33 = vmul.f32 -1.442695, %v232_v31 }
 0x277   :  { %311 = vpow2.f32 %v286_v33 }
 0x281   :  { %v312_v34 = vpop.eup %311 }
 0x282   :  { %v238_v35 = vadd.f32 1.0, %v312_v34 }
 0x284   :  { %313 = vrcp.f32 %v238_v35 }
 0x28e   :  { %v314_v37 = vpop.eup %313 }
 0x28f   :  { %v244_v38 = vrot.slane %v314_v37, %v243_v36  ;;  %v251_v40 = vrot.slane %v314_v37, %v250_v39 }
 0x291   :  { %246 = vbcast.lane.b32.xlu1 %v244_v38, 256 }
 0x295   :  { %253 = vbcast.lane.b32.xlu1 %v251_v40, 256 }
 0x303   :  { %v247_v41 = vpop.permute.xlu1 %246 }
 0x304   :  { %v255_v42 = vmul.f32 %v247_v41, %v414_v0  ;;  %v256_v43 = vmul.f32 %v247_v41, %v416_v1 }
 0x306   :  { %259 = vst [vmem:[#allocation5] sm:$0xff] %v255_v42  ;;  %260 = vst [vmem:[#allocation5 + $0x8] sm:$0xff] %v256_v43 }
 0x307   :  { %v254_v44 = vpop.permute.xlu1 %253 }
 0x308   :  { %v257_v45 = vmul.f32 %v254_v44, %v418_v2  ;;  %v258_v46 = vmul.f32 %v254_v44, %v422_v4 }
 0x30a   :  { %261 = vst [vmem:[#allocation5 + $0x10] sm:$0xff] %v257_v45  ;;  %262 = vst [vmem:[#allocation5 + $0x18] sm:$0xff] %v258_v46 }
 0x30b   :  { %348 = shalt.err (!%p345_p12)
}
 0x30c   :  { %s349_s15 = scalar_lea.hbm %s462_s5, 512 }
 0x30d   :  { %p350_p13 = scmp.ne.s32.totalorder %s462_s5, %s349_s15  ;;  %p353_p0 = scmp.lt.u32.totalorder %s349_s15, %s462_s5 }
 0x30f   :  { %p355_p1 = pnand %p353_p0, %p350_p13 }
 0x311   :  { %358 = shalt.err (!%p355_p1)
}
 0x312   :  { %274 = dma.vmem_to_hbm [thread:$0]  %s269_s4, 512, %s462_s5, [#allocation4], %s364_s28, %s364_s28, %s365_s29  }
 0x313   :  { %361 = dma.done.wait [#allocation4], 512  }
 0x314   :  { %362 = vsyncadd [#allocation4], 4294966784 }
 0x315   :  { %278 = vsyncpa [#allocation3], 1 }
 0x316   :  { %279 = vsyncpa [#allocation4], 1 }

</bundles_post_ra>
